<compile_context>
chip_gen: v6e
topology: v6e:2x2x1
jax: 0.10.0
libtpu: 0.0.40
codegen_flags: <defaults>
</compile_context>

<pallas_src>
import math
import functools

import jax
import jax.numpy as jnp
from jax.experimental import pallas as pl
from jax.experimental.pallas import tpu as pltpu


def _round_up(x, m):
    return ((x + m - 1) // m) * m


def _pos_embed_kernel(coords_ref, sel_ref, out_ref, *, normalize, scale):
    c = coords_ref[...]            # (TN, 3) f32
    if normalize:                  # static python bool -> specialized at trace time
        eps = 1e-6
        c = c / (c + eps) * scale
    sel = sel_ref[...]             # (4, 3*F) f32: x-coeffs, y-coeffs, z-coeffs, phase
    arg = (c[:, 0:1] * sel[0:1, :]
           + c[:, 1:2] * sel[1:2, :]
           + c[:, 2:3] * sel[2:3, :]
           + sel[3:4, :])          # (TN, 3*F) lane-dense, exact f32 (no MXU bf16 path)
    out_ref[...] = jnp.sin(arg).astype(out_ref.dtype)


def position_embedding_sine_sparse(coords, num_pos_feats=64, temperature=10000,
                                   normalize=False, scale=None, tile_n=512,
                                   out_dtype=jnp.float32):
    """JAX/Pallas equivalent of PositionEmbeddingSineSparse.forward.

    coords: (N, 3) array of (x, y, z); returns (N, 3 * num_pos_feats).
    """
    if scale is not None and normalize is False:
        raise ValueError("normalize should be True if scale is passed")
    if scale is None:
        scale = 2 * math.pi
    assert num_pos_feats % 2 == 0, "num_pos_feats must be even"
    half = num_pos_feats // 2
    out_dim = 3 * num_pos_feats

    coords = coords.astype(jnp.float32)
    n = coords.shape[0]

    # Tile selection: big tiles amortize the ~0.35us/step pipeline overhead on
    # this HBM-write-bound kernel, but never pad beyond one tile for small N.
    # (On v7x keep tile_n <= N/2 for large N so the grid spans both TCs.)
    tile_n = max(8, min(int(tile_n), _round_up(n, 8)))
    n_pad = _round_up(n, tile_n)
    if n_pad != n:
        coords = jnp.pad(coords, ((0, n_pad - n), (0, 0)))

    # dim_t exactly as in the PyTorch module; even/odd entries are identical,
    # so only the even half is needed.  Fold the reciprocal into the table so
    # the kernel multiplies instead of divides.
    ar = jnp.arange(num_pos_feats, dtype=jnp.float32)
    dim_t = jnp.float32(temperature) ** (2.0 * jnp.floor(ar / 2.0) / num_pos_feats)
    inv_block = jnp.tile(1.0 / dim_t[0::2], 2)           # (F,): [sin freqs | cos freqs]
    zeros = jnp.zeros((num_pos_feats,), jnp.float32)
    phase_block = jnp.concatenate([jnp.zeros((half,), jnp.float32),
                                   jnp.full((half,), math.pi / 2.0, jnp.float32)])
    sel = jnp.stack([
        jnp.concatenate([inv_block, zeros, zeros]),       # x coefficients
        jnp.concatenate([zeros, inv_block, zeros]),       # y coefficients
        jnp.concatenate([zeros, zeros, inv_block]),       # z coefficients
        jnp.tile(phase_block, 3),                         # 0 for sin cols, pi/2 for cos
    ], axis=0)                                            # (4, 3*F)

    kernel = functools.partial(_pos_embed_kernel, normalize=normalize,
                               scale=float(scale))

    out = pl.pallas_call(
        kernel,
        out_shape=jax.ShapeDtypeStruct((n_pad, out_dim), out_dtype),
        grid_spec=pltpu.PrefetchScalarGridSpec(
            num_scalar_prefetch=0,
            grid=(n_pad // tile_n,),
            in_specs=[
                pl.BlockSpec((tile_n, 3), lambda i: (i, 0)),      # coords tile
                pl.BlockSpec((4, out_dim), lambda i: (0, 0)),     # static coeff table
            ],
            out_specs=pl.BlockSpec((tile_n, out_dim), lambda i: (i, 0)),
        ),
        compiler_params=pltpu.CompilerParams(dimension_semantics=("parallel",)),
    )(coords, sel)

    # Avoid materializing an extra (N, 3F) copy when no padding was needed.
    return out if n_pad == n else out[:n]


def _reference(coords, num_pos_feats, temperature, normalize, scale):
    """Pure-JAX transcription of the PyTorch forward, for verification."""
    coords = coords.astype(jnp.float32)
    x_embed, y_embed, z_embed = coords[:, 0], coords[:, 1], coords[:, 2]
    if normalize:
        eps = 1e-6
        x_embed = x_embed / (x_embed + eps) * scale
        y_embed = y_embed / (y_embed + eps) * scale
        z_embed = z_embed / (z_embed + eps) * scale
    dim_t = jnp.arange(num_pos_feats, dtype=jnp.float32)
    dim_t = jnp.float32(temperature) ** (2.0 * jnp.floor(dim_t / 2.0) / num_pos_feats)

    def encode(e):
        p = e[:, None] / dim_t
        return jnp.stack(
            [jnp.sin(p[:, 0::2]), jnp.cos(p[:, 1::2])], axis=1
        ).reshape(e.shape[0], -1)

    return jnp.concatenate([encode(x_embed), encode(y_embed), encode(z_embed)], axis=1)


if __name__ == "__main__":
    key = jax.random.PRNGKey(0)
    N, F = 16, 64  # 16 sparse points, 64 positional features per axis
    coords = jax.random.uniform(key, (N, 3), minval=0.0, maxval=255.0,
                                dtype=jnp.float32)

    # normalize=False path
    out = position_embedding_sine_sparse(coords, num_pos_feats=F,
                                         temperature=10000, normalize=False)
    out = jax.block_until_ready(out)
    ref = _reference(coords, F, 10000, False, 2 * math.pi)
    assert out.shape == (N, 3 * F), out.shape
    # cos(x) is evaluated as sin(x + pi/2) and 1/dim_t is folded in as a
    # multiply, so allow small absolute slack at |arg| up to ~255.
    assert jnp.allclose(out, ref, rtol=0.0, atol=2e-3), \
        float(jnp.max(jnp.abs(out - ref)))

    # normalize=True path
    out_n = position_embedding_sine_sparse(coords, num_pos_feats=F,
                                           temperature=10000, normalize=True,
                                           scale=2 * math.pi)
    out_n = jax.block_until_ready(out_n)
    ref_n = _reference(coords, F, 10000, True, 2 * math.pi)
    assert jnp.allclose(out_n, ref_n, rtol=0.0, atol=2e-3), \
        float(jnp.max(jnp.abs(out_n - ref_n)))

    print("KERNEL_OK")
</pallas_src>

<mosaic_0001>
module attributes {stable_mosaic.version = 11 : i64} {
  func.func @_pos_embed_kernel(%arg0: i32, %arg1: memref<16x3xf32, #tpu.memory_space<vmem>>, %arg2: memref<4x192xf32, #tpu.memory_space<vmem>>, %arg3: memref<16x192xf32, #tpu.memory_space<vmem>>) attributes {dimension_semantics = [#tpu.dimension_semantics<parallel>], iteration_bounds = array<i64: 1>, scalar_prefetch = 0 : i64, scratch_operands = 0 : i64, tpu.core_type = #tpu.core_type<tc>, window_params = [{transform_indices = @transform_0, window_bounds = array<i64: 16, 3>}, {pipeline_mode = #tpu.pipeline_mode<synchronous>, transform_indices = @transform_1, window_bounds = array<i64: 4, 192>}, {transform_indices = @transform_2, window_bounds = array<i64: 16, 192>}]} {
    %c0 = arith.constant 0 : index
    %c0_0 = arith.constant 0 : index
    %0 = vector.load %arg1[%c0, %c0_0] : memref<16x3xf32, #tpu.memory_space<vmem>>, vector<16x3xf32>
    %c0_1 = arith.constant 0 : index
    %c0_2 = arith.constant 0 : index
    %1 = vector.load %arg2[%c0_1, %c0_2] : memref<4x192xf32, #tpu.memory_space<vmem>>, vector<4x192xf32>
    %2 = vector.extract_strided_slice %0 {offsets = [0, 0], sizes = [16, 1], strides = [1, 1]} : vector<16x3xf32> to vector<16x1xf32>
    %3 = vector.extract_strided_slice %1 {offsets = [0, 0], sizes = [1, 192], strides = [1, 1]} : vector<4x192xf32> to vector<1x192xf32>
    %4 = vector.broadcast %2 : vector<16x1xf32> to vector<16x192xf32>
    %5 = vector.broadcast %3 : vector<1x192xf32> to vector<16x192xf32>
    %6 = arith.mulf %4, %5 : vector<16x192xf32>
    %7 = vector.extract_strided_slice %0 {offsets = [0, 1], sizes = [16, 1], strides = [1, 1]} : vector<16x3xf32> to vector<16x1xf32>
    %8 = vector.extract_strided_slice %1 {offsets = [1, 0], sizes = [1, 192], strides = [1, 1]} : vector<4x192xf32> to vector<1x192xf32>
    %9 = vector.broadcast %7 : vector<16x1xf32> to vector<16x192xf32>
    %10 = vector.broadcast %8 : vector<1x192xf32> to vector<16x192xf32>
    %11 = arith.mulf %9, %10 : vector<16x192xf32>
    %12 = arith.addf %6, %11 : vector<16x192xf32>
    %13 = vector.extract_strided_slice %0 {offsets = [0, 2], sizes = [16, 1], strides = [1, 1]} : vector<16x3xf32> to vector<16x1xf32>
    %14 = vector.extract_strided_slice %1 {offsets = [2, 0], sizes = [1, 192], strides = [1, 1]} : vector<4x192xf32> to vector<1x192xf32>
    %15 = vector.broadcast %13 : vector<16x1xf32> to vector<16x192xf32>
    %16 = vector.broadcast %14 : vector<1x192xf32> to vector<16x192xf32>
    %17 = arith.mulf %15, %16 : vector<16x192xf32>
    %18 = arith.addf %12, %17 : vector<16x192xf32>
    %19 = vector.extract_strided_slice %1 {offsets = [3, 0], sizes = [1, 192], strides = [1, 1]} : vector<4x192xf32> to vector<1x192xf32>
    %20 = vector.broadcast %19 : vector<1x192xf32> to vector<16x192xf32>
    %21 = arith.addf %18, %20 : vector<16x192xf32>
    %22 = math.sin %21 : vector<16x192xf32>
    %c0_3 = arith.constant 0 : index
    %c0_4 = arith.constant 0 : index
    %23 = vector.load %arg3[%c0_3, %c0_4] : memref<16x192xf32, #tpu.memory_space<vmem>>, vector<16x192xf32>
    tpu.vector_store %arg3[%c0_3, %c0_4], %22 {strides = array<i32>} : memref<16x192xf32, #tpu.memory_space<vmem>>, vector<16x192xf32>,
    return
  }
  func.func @transform_0(%arg0: i32) -> (i32, i32) {
    %c0_i32 = arith.constant 0 : i32
    %c0_i32_0 = arith.constant 0 : i32
    return %arg0, %c0_i32 : i32, i32
  }
  func.func @transform_1(%arg0: i32) -> (i32, i32) {
    %c0_i32 = arith.constant 0 : i32
    %c0_i32_0 = arith.constant 0 : i32
    %c0_i32_1 = arith.constant 0 : i32
    return %c0_i32, %c0_i32_0 : i32, i32
  }
  func.func @transform_2(%arg0: i32) -> (i32, i32) {
    %c0_i32 = arith.constant 0 : i32
    %c0_i32_0 = arith.constant 0 : i32
    return %arg0, %c0_i32 : i32, i32
  }
}

</mosaic_0001>

<bundles_post_ra>
// kernel: tpu_custom_call.1
= control target key start
LH: loop header
LB: loop body
LE: loop exit
PB: predicated region body
PF: predicated region fallthrough
CT: control target
= control target key end

     0   :  { %v661_v1 = vmov 1   ;;  %v662_v2 = vmov 0   ;;  %s990_s0 = inlined_call_operand.vmem [shape: f32[16,3], index: 0, kind: input, shape index: {}]   ;;  %s991_s1 = inlined_call_operand.vmem [shape: f32[4,192], index: 1, kind: input, shape index: {}]   ;;  %s992_s2 = inlined_call_operand.hbm [shape: f32[16,192], index: 2, kind: output, shape index: {}]  }
   0x1   :  { %v12_v0 = vld [vmem:[%s990_s0] sm:$0xff]  ;;  %620 = vset.pattern.permute.xlu1 %v661_v1  ;;  %619 = vset.pattern.permute.xlu0 %v662_v2 }
   0x2   :  { %7 = vsyncpa [#allocation3], 0  ;;  %49 = vperm.xlu1 %620, %v12_v0   ;;  %17 = vperm.xlu0 %619, %v12_v0   ;;  %v13_v3 = vld [vmem:[%s990_s0 + $0x8] sm:$0xff]  ;;  %v663_v4 = vmov 2   ;;  %v26_v5 = vlaneseq  ;;  %v14_v9 = vld [vmem:[%s991_s1] sm:$0xff]  ;;  %s670_s0 = smov [#allocation2]  }
   0x3   :  { %s564_s1 = sshll.u32 %s670_s0, 4  ;;  %s565_s1 = int_to_ptr.vmem [resolvable:$true] %s564_s1 }
   0x4   :  { %v27_v6 = vshrl.u32 %v26_v5, 7  ;;  %s639_s15 = scalar_lea.vmem %s565_s1, 512  ;;  %p644_p1 = scmp.lt.s32.totalorder %s565_s1, %s565_s1 }
   0x5   :  { %p640_p0 = scmp.ne.s32.totalorder %s565_s1, %s639_s15  ;;  %p645_p2 = scmp.lt.s32.totalorder %s639_s15, %s639_s15 }
   0x6   :  { %53 = vperm.xlu1 %620, %v13_v3   ;;  %22 = vperm.xlu0 %619, %v13_v3   ;;  %v58_v7 = vsub.s32 1, %v27_v6  ;;  %v28_v8 = vsub.s32 0, %v27_v6  ;;  %v62_v10 = vsub.s32 5, %v27_v6  ;;  %v32_v11 = vsub.s32 4, %v27_v6 }
   0x7   :  { %v92_v14 = vsub.s32 2, %v27_v6  ;;  %v96_v15 = vsub.s32 6, %v27_v6  ;;  %v118_v20 = vsub.s32 3, %v27_v6  ;;  %v122_v21 = vsub.s32 7, %v27_v6  ;;  %p646_p3 = por %p645_p2, %p644_p1 }
   0x8   :  { %v59_v12 = vrot.slane %v14_v9, %v58_v7  ;;  %v29_v13 = vrot.slane %v14_v9, %v28_v8  ;;  %v63_v16 = vrot.slane %v14_v9, %v62_v10  ;;  %v33_v18 = vrot.slane %v14_v9, %v32_v11 }
   0x9   :  { %v93_v24 = vrot.slane %v14_v9, %v92_v14  ;;  %v97_v25 = vrot.slane %v14_v9, %v96_v15  ;;  %v119_v30 = vrot.slane %v14_v9, %v118_v20  ;;  %v123_v31 = vrot.slane %v14_v9, %v122_v21  ;;  %p647_p4 = pnand %p646_p3, %p640_p0 }
   0xa   :  { %622 = vset.pattern.permute.xlu1 %v663_v4  ;;  %621 = vset.pattern.permute.xlu0 %v663_v4  ;;  %v69_v22 = vrot.slane %v59_v12, %v58_v7  ;;  %v39_v23 = vrot.slane %v29_v13, %v28_v8  ;;  %v73_v26 = vrot.slane %v63_v16, %v58_v7 }
   0xb   :  { %87 = vperm.xlu1 %622, %v13_v3   ;;  %83 = vperm.xlu0 %621, %v12_v0   ;;  %v43_v27 = vrot.slane %v33_v18, %v28_v8  ;;  %v103_v38 = vrot.slane %v93_v24, %v92_v14  ;;  %v107_v39 = vrot.slane %v97_v25, %v92_v14  ;;  %v664_v25 = vmov 683565275  }
   0xc   :  { %v129_v42 = vrot.slane %v119_v30, %v118_v20  ;;  %v133_v43 = vrot.slane %v123_v31, %v118_v20  ;;  %v666_v31 = vmov 2131351028  }
  0x7d   :  { %v50_v17 = vpop.permute.xlu1 %49  ;;  %v18_v19 = vpop.permute.xlu0 %17 }
  0x7e   :  { %v74_v32 = vmul.f32 %v69_v22, %v50_v17  ;;  %v44_v33 = vmul.f32 %v39_v23, %v18_v19  ;;  %v75_v55 = vmul.f32 %v73_v26, %v50_v17  ;;  %v45_v57 = vmul.f32 %v43_v27, %v18_v19 }
  0x80   :  { %v78_v40 = vadd.f32 %v74_v32, %v44_v33  ;;  %v79_v4 = vadd.f32 %v75_v55, %v45_v57  ;;  %v667_v33 = vmov 2102212464  }
  0x81   :  { %v54_v28 = vpop.permute.xlu1 %53  ;;  %v23_v29 = vpop.permute.xlu0 %22 }
  0x82   :  { %v76_v34 = vmul.f32 %v69_v22, %v54_v28  ;;  %v46_v35 = vmul.f32 %v39_v23, %v23_v29  ;;  %v77_v36 = vmul.f32 %v73_v26, %v54_v28  ;;  %v47_v37 = vmul.f32 %v43_v27, %v23_v29 }
  0x83   :  { %v665_v29 = vmov 2475754826  }
  0x84   :  { %v80_v41 = vadd.f32 %v76_v34, %v46_v35  ;;  %v81_v46 = vadd.f32 %v77_v36, %v47_v37  ;;  %v668_v35 = vmov 920167782  }
  0x86   :  { %v88_v44 = vpop.permute.xlu1 %87  ;;  %v84_v45 = vpop.permute.xlu0 %83 }
  0x87   :  { %v110_v47 = vmul.f32 %v103_v38, %v88_v44  ;;  %v111_v48 = vmul.f32 %v107_v39, %v88_v44  ;;  %v108_v49 = vmul.f32 %v103_v38, %v84_v45  ;;  %v109_v63 = vmul.f32 %v107_v39, %v84_v45 }
  0x89   :  { %v114_v50 = vadd.f32 %v110_v47, %v80_v41  ;;  %v115_v51 = vadd.f32 %v111_v48, %v81_v46  ;;  %v112_v52 = vadd.f32 %v108_v49, %v78_v40  ;;  %v113_v9 = vadd.f32 %v109_v63, %v79_v4 }
  0x8b   :  { %v697_v53 = vadd.f32 %v129_v42, %v114_v50  ;;  %v699_v54 = vadd.f32 %v133_v43, %v115_v51  ;;  %v701_v56 = vadd.f32 %v129_v42, %v112_v52  ;;  %v713_v19 = vadd.f32 %v133_v43, %v113_v9 }
  0x8c   :  { %v669_v42 = vmov 1326507024  }
  0x8d   :  { %v346_v58 = vand.u32 2147483647, %v697_v53  ;;  %v349_v59 = vand.u32 2139095040, %v697_v53  ;;  %v450_v60 = vand.u32 2147483647, %v699_v54  ;;  %v453_v61 = vand.u32 2139095040, %v699_v54 }
  0x8e   :  { %v141_v3 = vand.u32 2139095040, %v701_v56  ;;  %v138_v10 = vand.u32 2147483647, %v701_v56 }
  0x8f   :  { %v350_v62 = vshrl.u32 %v349_v59, 23  ;;  %v353_v0 = vand.u32 8388607, %v346_v58  ;;  %v454_v1 = vshrl.u32 %v453_v61, 23  ;;  %v457_v2 = vand.u32 8388607, %v450_v60 }
  0x90   :  { %v142_v7 = vshrl.u32 %v141_v3, 23  ;;  %v721_v22 = vand.u32 8388607, %v138_v10 }
  0x91   :  { %v583_v5 = vadd.s32 4294967169, %v350_v62  ;;  %v587_v6 = vadd.s32 4294967169, %v454_v1  ;;  %v354_v11 = vor.u32 8388608, %v353_v0  ;;  %v458_v12 = vor.u32 8388608, %v457_v2 }
  0x92   :  { %v575_v14 = vadd.s32 4294967169, %v142_v7 }
  0x93   :  { %v356_v8 = vadd.s32 1, %v583_v5  ;;  %v460_v13 = vadd.s32 1, %v587_v6  ;;  %v715_v20 = vshll.u32 %v354_v11, 8  ;;  %v717_v21 = vshll.u32 %v458_v12, 8 }
  0x94   :  { %v723_v23 = vadd.s32 1, %v575_v14 }
  0x95   :  { %vm357_vm0 = vcmp.gt.s32.totalorder %v356_v8, 0  ;;  %vm461_vm1 = vcmp.gt.s32.totalorder %v460_v13, 0 }
  0x96   :  { %v358_v15 = vsel %vm357_vm0, %v356_v8, 0  ;;  %v462_v18 = vsel %vm461_vm1, %v460_v13, 0  ;;  %vm149_vm6 = vcmp.gt.s32.totalorder %v723_v23, 0 }
  0x97   :  { %v359_v16 = vshrl.u32 %v358_v15, 5  ;;  %v360_v17 = vand.u32 31, %v358_v15  ;;  %v726_v27 = vshrl.u32 %v462_v18, 5  ;;  %v464_v28 = vand.u32 31, %v462_v18 }
  0x99   :  { %v361_v24 = vsub.s32 32, %v360_v17  ;;  %v363_v26 = vshll.u32 %v664_v25, %v360_v17  ;;  %v366_v30 = vshll.u32 %v665_v29, %v360_v17  ;;  %v369_v32 = vshll.u32 %v666_v31, %v360_v17 }
  0x9a   :  { %v372_v34 = vshll.u32 %v667_v33, %v360_v17  ;;  %v375_v36 = vshll.u32 %v668_v35, %v360_v17  ;;  %vm378_vm2 = vcmp.lt.s32.totalorder %v359_v16, 1  ;;  %vm379_vm3 = vcmp.lt.s32.totalorder %v359_v16, 2 }
  0x9b   :  { %v364_v37 = vshrl.u32 %v665_v29, %v361_v24  ;;  %v367_v38 = vshrl.u32 %v666_v31, %v361_v24  ;;  %v370_v39 = vshrl.u32 %v667_v33, %v361_v24  ;;  %v362_v40 = vshrl.u32 %v664_v25, %v361_v24 }
  0x9c   :  { %v373_v41 = vshrl.u32 %v668_v35, %v361_v24  ;;  %v376_v43 = vshrl.u32 %v669_v42, %v361_v24  ;;  %v465_v47 = vsub.s32 32, %v464_v28  ;;  %vm380_vm4 = vcmp.lt.s32.totalorder %v359_v16, 3 }
  0x9d   :  { %v365_v44 = vor.u32 %v364_v37, %v363_v26  ;;  %v368_v45 = vor.u32 %v367_v38, %v366_v30  ;;  %v371_v46 = vor.u32 %v370_v39, %v369_v32  ;;  %vm381_vm5 = vcmp.lt.s32.totalorder %v359_v16, 4 }
  0x9e   :  { %v374_v48 = vor.u32 %v373_v41, %v372_v34  ;;  %v377_v49 = vor.u32 %v376_v43, %v375_v36  ;;  %v467_v62 = vshll.u32 %v664_v25, %v464_v28  ;;  %v468_v1 = vshrl.u32 %v665_v29, %v465_v47 }
  0x9f   :  { %v382_v50 = vsel %vm378_vm2, %v362_v40, %v365_v44  ;;  %v383_v51 = vsel %vm381_vm5, %v371_v46, 2102212464  ;;  %v386_v52 = vsel %vm378_vm2, %v365_v44, %v368_v45  ;;  %v390_v55 = vsel %vm378_vm2, %v368_v45, %v371_v46 }
  0xa0   :  { %v384_v57 = vsel %vm380_vm4, %v368_v45, %v383_v51  ;;  %v387_v59 = vsel %vm381_vm5, %v374_v48, 920167782  ;;  %v391_v61 = vsel %vm381_vm5, %v377_v49, 1326507024  ;;  %v470_v2 = vshll.u32 %v665_v29, %v464_v28 }
  0xa1   :  { %v388_v63 = vsel %vm380_vm4, %v371_v46, %v387_v59  ;;  %v392_v0 = vsel %vm380_vm4, %v374_v48, %v391_v61  ;;  %v385_v3 = vsel %vm379_vm3, %v382_v50, %v384_v57  ;;  %v471_v6 = vshrl.u32 %v666_v31, %v465_v47 }
  0xa2   :  { %v389_v4 = vsel %vm379_vm3, %v386_v52, %v388_v63  ;;  %v393_v5 = vsel %vm379_vm3, %v390_v55, %v392_v0  ;;  %v469_v12 = vor.u32 %v468_v1, %v467_v62  ;;  %v473_v14 = vshll.u32 %v666_v31, %v464_v28 }
  0xa3   :  { %v750_v7 = vmul.u32.u64.low %v715_v20, %v393_v5  ;;  %v751_v8 = vmul.u32.u64.high %v715_v20, %v393_v5, %v750_v7  ;;  %v754_v9 = vmul.u32.u64.low %v715_v20, %v389_v4  ;;  %v755_v11 = vmul.u32.u64.high %v715_v20, %v389_v4, %v754_v9 }
  0xa4   :  { %v472_v13 = vor.u32 %v471_v6, %v470_v2  ;;  %v474_v15 = vshrl.u32 %v667_v33, %v465_v47  ;;  %v466_v16 = vshrl.u32 %v664_v25, %v465_v47  ;;  %v476_v17 = vshll.u32 %v667_v33, %v464_v28 }
  0xa5   :  { %v477_v18 = vshrl.u32 %v668_v35, %v465_v47  ;;  %v480_v24 = vshrl.u32 %v669_v42, %v465_v47  ;;  %v401_v26 = vmul.u32 %v715_v20, %v385_v3  ;;  %v479_v32 = vshll.u32 %v668_v35, %v464_v28 }
  0xa6   :  { %v475_v30 = vor.u32 %v474_v15, %v473_v14  ;;  %vm482_vm7 = vcmp.lt.s32.totalorder %v726_v27, 1  ;;  %vm403_vm8 = vc.u32 %v751_v8, %v754_v9  ;;  %v404_v34 = vadd.s32 1, %v755_v11 }
  0xa7   :  { %v478_v36 = vor.u32 %v477_v18, %v476_v17  ;;  %vm483_vm9 = vcmp.lt.s32.totalorder %v726_v27, 2  ;;  %v481_v37 = vor.u32 %v480_v24, %v479_v32  ;;  %vm484_vm10 = vcmp.lt.s32.totalorder %v726_v27, 3 }
  0xa8   :  { %vm485_vm11 = vcmp.lt.s32.totalorder %v726_v27, 4  ;;  %v490_v38 = vsel %vm482_vm7, %v469_v12, %v472_v13  ;;  %v405_v20 = vsel %vm403_vm8, %v404_v34, %v755_v11  ;;  %v494_v40 = vsel %vm482_vm7, %v472_v13, %v475_v30 }
  0xa9   :  { %v487_v39 = vsel %vm485_vm11, %v475_v30, 2102212464  ;;  %v491_v28 = vsel %vm485_vm11, %v478_v36, 920167782  ;;  %v406_v41 = vadd.s32 %v405_v20, %v401_v26  ;;  %v486_v43 = vsel %vm482_vm7, %v466_v16, %v469_v12 }
  0xaa   :  { %v492_v44 = vsel %vm484_vm10, %v475_v30, %v491_v28  ;;  %v495_v45 = vsel %vm485_vm11, %v481_v37, 1326507024  ;;  %v488_v46 = vsel %vm484_vm10, %v472_v13, %v487_v39  ;;  %v150_v49 = vsel %vm149_vm6, %v723_v23, 0 }
  0xab   :  { %v493_v47 = vsel %vm483_vm9, %v490_v38, %v492_v44  ;;  %v496_v48 = vsel %vm484_vm10, %v478_v36, %v495_v45  ;;  %v407_v50 = vadd.s32 536870912, %v406_v41  ;;  %v146_v61 = vor.u32 8388608, %v721_v22 }
  0xac   :  { %v497_v51 = vsel %vm483_vm9, %v494_v40, %v496_v48  ;;  %v782_v52 = vmul.u32.u64.low %v717_v21, %v493_v47  ;;  %v783_v55 = vmul.u32.u64.high %v717_v21, %v493_v47, %v782_v52  ;;  %v242_v62 = vand.u32 2147483647, %v713_v19 }
  0xad   :  { %v787_v57 = vmul.u32.u64.low %v717_v21, %v497_v51  ;;  %v788_v59 = vmul.u32.u64.high %v717_v21, %v497_v51, %v787_v57  ;;  %v792_v63 = vshrl.u32 %v407_v50, 30  ;;  %v489_v23 = vsel %vm483_vm9, %v486_v43, %v488_v46 }
  0xae   :  { %v152_v0 = vand.u32 31, %v150_v49  ;;  %v245_v1 = vand.u32 2139095040, %v713_v19  ;;  %v508_v3 = vadd.s32 1, %v783_v55  ;;  %v505_v5 = vmul.u32 %v717_v21, %v489_v23 }
  0xaf   :  { %v409_v2 = vshll.u32 %v792_v63, 30  ;;  %vm507_vm12 = vc.u32 %v788_v59, %v782_v52  ;;  %v802_v22 = vshll.u32 %v146_v61, 8  ;;  %v806_v6 = vand.u32 8388607, %v242_v62 }
  0xb0   :  { %v153_v4 = vsub.s32 32, %v152_v0  ;;  %v509_v7 = vsel %vm507_vm12, %v508_v3, %v783_v55  ;;  %v155_v11 = vshll.u32 %v664_v25, %v152_v0  ;;  %v246_v12 = vshrl.u32 %v245_v1, 23 }
  0xb1   :  { %v808_v27 = vsub.s32 %v406_v41, %v409_v2  ;;  %v510_v13 = vadd.s32 %v509_v7, %v505_v5  ;;  %v158_v21 = vshll.u32 %v665_v29, %v152_v0  ;;  %v151_v17 = vshrl.u32 %v150_v49, 5 }
  0xb2   :  { %v156_v14 = vshrl.u32 %v665_v29, %v153_v4  ;;  %v159_v15 = vshrl.u32 %v666_v31, %v153_v4  ;;  %v161_v18 = vshll.u32 %v666_v31, %v152_v0  ;;  %v162_v24 = vshrl.u32 %v667_v33, %v153_v4 }
  0xb3   :  { %v412_v16 = vsub.s32 0, %v808_v27  ;;  %v402_v26 = vadd.s32 %v754_v9, %v751_v8  ;;  %v511_v30 = vadd.s32 536870912, %v510_v13  ;;  %v164_v38 = vshll.u32 %v667_v33, %v152_v0 }
  0xb4   :  { %v157_v32 = vor.u32 %v156_v14, %v155_v11  ;;  %v160_v34 = vor.u32 %v159_v15, %v158_v21  ;;  %v163_v37 = vor.u32 %v162_v24, %v161_v18  ;;  %v165_v20 = vshrl.u32 %v668_v35, %v153_v4 }
  0xb5   :  { %v584_v36 = vmin.u32 %v412_v16, %v808_v27  ;;  %v823_v39 = vshrl.u32 %v511_v30, 30  ;;  %v167_v28 = vshll.u32 %v668_v35, %v152_v0  ;;  %v168_v40 = vshrl.u32 %v669_v42, %v153_v4 }
  0xb6   :  { %v579_v41 = vadd.s32 4294967169, %v246_v12  ;;  %v166_v44 = vor.u32 %v165_v20, %v164_v38  ;;  %vm170_vm13 = vcmp.lt.s32.totalorder %v151_v17, 1  ;;  %vm171_vm14 = vcmp.lt.s32.totalorder %v151_v17, 2 }
  0xb7   :  { %v414_v43 = vclz %v584_v36  ;;  %v513_v8 = vshll.u32 %v823_v39, 30  ;;  %v169_v9 = vor.u32 %v168_v40, %v167_v28  ;;  %vm172_vm15 = vcmp.lt.s32.totalorder %v151_v17, 3 }
  0xb8   :  { %vm173_vm0 = vcmp.lt.s32.totalorder %v151_v17, 4  ;;  %v178_v46 = vsel %vm170_vm13, %v157_v32, %v160_v34  ;;  %v182_v48 = vsel %vm170_vm13, %v160_v34, %v163_v37  ;;  %v432_v57 = vsub.s32 4, %v792_v63 }
  0xb9   :  { %v585_v45 = vadd.s32 4294967294, %v414_v43  ;;  %v179_v47 = vsel %vm173_vm0, %v166_v44, 920167782  ;;  %v830_v49 = vsub.s32 %v510_v13, %v513_v8  ;;  %v175_v50 = vsel %vm173_vm0, %v163_v37, 2102212464 }
  0xba   :  { %v180_v51 = vsel %vm172_vm15, %v163_v37, %v179_v47  ;;  %v183_v55 = vsel %vm173_vm0, %v169_v9, 1326507024  ;;  %v154_v61 = vshrl.u32 %v664_v25, %v153_v4  ;;  %v176_v12 = vsel %vm172_vm15, %v160_v34, %v175_v50 }
  0xbb   :  { %vm586_vm1 = vcmp.lt.s32.totalorder %v585_v45, 0  ;;  %v184_v23 = vsel %vm172_vm15, %v166_v44, %v183_v55  ;;  %v516_v1 = vsub.s32 0, %v830_v49  ;;  %v181_v2 = vsel %vm171_vm14, %v178_v46, %v180_v51 }
  0xbc   :  { %v417_v0 = vsel %vm586_vm1, 0, %v585_v45  ;;  %v185_v3 = vsel %vm171_vm14, %v182_v48, %v184_v23  ;;  %v174_v11 = vsel %vm170_vm13, %v154_v61, %v157_v32  ;;  %vm348_vm2 = vcmp.lt.s32.totalorder %v697_v53, 0 }
  0xbd   :  { %v418_v5 = vsub.s32 32, %v417_v0  ;;  %v422_v7 = vsub.s32 4294967266, %v417_v0  ;;  %v419_v13 = vshll.u32 %v808_v27, %v417_v0  ;;  %v588_v14 = vmin.u32 %v516_v1, %v830_v49 }
  0xbe   :  { %v844_v4 = vmul.u32.u64.low %v802_v22, %v185_v3  ;;  %v845_v21 = vmul.u32.u64.high %v802_v22, %v185_v3, %v844_v4  ;;  %v848_v18 = vmul.u32.u64.low %v802_v22, %v181_v2  ;;  %v849_v24 = vmul.u32.u64.high %v802_v22, %v181_v2, %v848_v18 }
  0xbf   :  { %v420_v15 = vshrl.u32 %v402_v26, %v418_v5  ;;  %v423_v16 = vadd.s32 127, %v422_v7  ;;  %v518_v30 = vclz %v588_v14  ;;  %v252_v32 = vadd.s32 1, %v579_v41 }
  0xc0   :  { %v433_v27 = vsel %vm348_vm2, %v432_v57, %v792_v63  ;;  %v177_v37 = vsel %vm171_vm14, %v174_v11, %v176_v12  ;;  %vm859_vm3 = vcmp.le.f32.partialorder %v346_v58, 0.7853982  ;;  %vm195_vm4 = vc.u32 %v845_v21, %v848_v18 }
  0xc1   :  { %v421_v34 = vor.u32 %v420_v15, %v419_v13  ;;  %v424_v36 = vshll.u32 %v423_v16, 23  ;;  %v589_v38 = vadd.s32 4294967294, %v518_v30  ;;  %vm253_vm5 = vcmp.gt.s32.totalorder %v252_v32, 0 }
  0xc2   :  { %v196_v28 = vadd.s32 1, %v849_v24  ;;  %v250_v40 = vor.u32 8388608, %v806_v6  ;;  %v254_v41 = vsel %vm253_vm5, %v252_v32, 0  ;;  %v435_v63 = vsel %vm859_vm3, 0, %v433_v27 }
  0xc3   :  { %v425_v20 = vor.u32 4788187, %v424_v36  ;;  %vm590_vm6 = vcmp.lt.s32.totalorder %v589_v38, 0  ;;  %v193_v58 = vmul.u32 %v802_v22, %v177_v37  ;;  %v256_v17 = vand.u32 31, %v254_v41 }
  0xc4   :  { %v428_v44 = vcvt.s32.f32 %v421_v34  ;;  %v521_v8 = vsel %vm590_vm6, 0, %v589_v38  ;;  %v197_v9 = vsel %vm195_vm4, %v196_v28, %v849_v24  ;;  %v506_v45 = vadd.s32 %v782_v52, %v788_v59 }
  0xc5   :  { %v426_v43 = vand.u32 2147483647, %v425_v20  ;;  %v522_v46 = vsub.s32 32, %v521_v8  ;;  %v526_v47 = vsub.s32 4294967266, %v521_v8  ;;  %v198_v48 = vadd.s32 %v197_v9, %v193_v58 }
  0xc6   :  { %v439_v50 = vadd.s32 3, %v435_v63  ;;  %v257_v51 = vsub.s32 32, %v256_v17  ;;  %v873_v55 = vshll.u32 %v250_v40, 8  ;;  %v523_v57 = vshll.u32 %v830_v49, %v521_v8 }
  0xc7   :  { %v429_v6 = vmul.f32 %v428_v44, %v426_v43  ;;  %v524_v22 = vshrl.u32 %v506_v45, %v522_v46  ;;  %v527_v61 = vadd.s32 127, %v526_v47  ;;  %v199_v23 = vadd.s32 536870912, %v198_v48 }
  0xc8   :  { %v876_v1 = vshrl.u32 %v254_v41, 5  ;;  %v259_v2 = vshll.u32 %v664_v25, %v256_v17  ;;  %v260_v52 = vshrl.u32 %v665_v29, %v257_v51  ;;  %v266_v7 = vshrl.u32 %v667_v33, %v257_v51 }
  0xc9   :  { %v430_v0 = vxor.u32 2147483648, %v429_v6  ;;  %v525_v59 = vor.u32 %v524_v22, %v523_v57  ;;  %v528_v3 = vshll.u32 %v527_v61, 23  ;;  %v880_v5 = vshrl.u32 %v199_v23, 30 }
  0xca   :  { %vm452_vm7 = vcmp.lt.s32.totalorder %v699_v54, 0  ;;  %v262_v49 = vshll.u32 %v665_v29, %v256_v17  ;;  %v263_v12 = vshrl.u32 %v666_v31, %v257_v51  ;;  %v265_v13 = vshll.u32 %v666_v31, %v256_v17 }
  0xcb   :  { %v431_v11 = vsel %vm348_vm2, %v430_v0, %v429_v6  ;;  %vm894_vm8 = vcmp.le.f32.partialorder %v450_v60, 0.7853982  ;;  %v529_v15 = vor.u32 4788187, %v528_v3  ;;  %v201_v16 = vshll.u32 %v880_v5, 30 }
  0xcc   :  { %v434_v14 = vsel %vm859_vm3, %v697_v53, %v431_v11  ;;  %v261_v24 = vor.u32 %v260_v52, %v259_v2  ;;  %v532_v29 = vcvt.s32.f32 %v525_v59  ;;  %v268_v30 = vshll.u32 %v667_v33, %v256_v17 }
  0xcd   :  { %623 = vcosq.f32 %v434_v14  ;;  %v269_v31 = vshrl.u32 %v668_v35, %v257_v51  ;;  %v530_v32 = vand.u32 2147483647, %v529_v15  ;;  %v202_v34 = vsub.s32 %v198_v48, %v201_v16 }
  0xce   :  { %625 = vsinq.f32 %v434_v14  ;;  %v267_v36 = vor.u32 %v266_v7, %v265_v13  ;;  %v264_v27 = vor.u32 %v263_v12, %v262_v49  ;;  %v271_v60 = vshll.u32 %v668_v35, %v256_v17 }
  0xcf   :  { %v270_v37 = vor.u32 %v269_v31, %v268_v30  ;;  %v272_v26 = vshrl.u32 %v669_v42, %v257_v51  ;;  %v903_v38 = vand.u32 3, %v439_v50  ;;  %v533_v20 = vmul.f32 %v532_v29, %v530_v32 }
  0xd0   :  { %v536_v28 = vsub.s32 4, %v823_v39  ;;  %v204_v40 = vsub.s32 0, %v202_v34  ;;  %v258_v33 = vshrl.u32 %v664_v25, %v257_v51  ;;  %vm274_vm9 = vcmp.lt.s32.totalorder %v876_v1, 1 }
  0xd1   :  { %v273_v41 = vor.u32 %v272_v26, %v271_v60  ;;  %vm277_vm10 = vcmp.lt.s32.totalorder %v876_v1, 4  ;;  %v534_v63 = vxor.u32 2147483648, %v533_v20  ;;  %vm275_vm11 = vcmp.lt.s32.totalorder %v876_v1, 2 }
  0xd2   :  { %v576_v58 = vmin.u32 %v204_v40, %v202_v34  ;;  %v279_v35 = vsel %vm277_vm10, %v267_v36, 2102212464  ;;  %vm276_vm12 = vcmp.lt.s32.totalorder %v876_v1, 3  ;;  %v278_v42 = vsel %vm274_vm9, %v258_v33, %v261_v24 }
  0xd3   :  { %v282_v25 = vsel %vm274_vm9, %v261_v24, %v264_v27  ;;  %v283_v17 = vsel %vm277_vm10, %v270_v37, 920167782  ;;  %v535_v43 = vsel %vm452_vm7, %v534_v63, %v533_v20  ;;  %v280_v8 = vsel %vm276_vm12, %v264_v27, %v279_v35 }
  0xd4   :  { %v206_v44 = vclz %v576_v58  ;;  %v284_v9 = vsel %vm276_vm12, %v267_v36, %v283_v17  ;;  %v538_v45 = vsel %vm894_vm8, %v699_v54, %v535_v43  ;;  %v286_v47 = vsel %vm274_vm9, %v264_v27, %v267_v36 }
  0xd5   :  { %v285_v46 = vsel %vm275_vm11, %v282_v25, %v284_v9  ;;  %v287_v48 = vsel %vm277_vm10, %v273_v41, 1326507024  ;;  %v537_v6 = vsel %vm452_vm7, %v536_v28, %v823_v39  ;;  %627 = vcosq.f32 %v538_v45 }
  0xd6   :  { %v577_v50 = vadd.s32 4294967294, %v206_v44  ;;  %v288_v51 = vsel %vm276_vm12, %v270_v37, %v287_v48  ;;  %629 = vsinq.f32 %v538_v45  ;;  %v281_v23 = vsel %vm275_vm11, %v278_v42, %v280_v8 }
  0xd7   :  { %v289_v57 = vsel %vm275_vm11, %v286_v47, %v288_v51  ;;  %v936_v22 = vmul.u32.u64.low %v873_v55, %v285_v46  ;;  %v937_v61 = vmul.u32.u64.high %v873_v55, %v285_v46, %v936_v22  ;;  %v539_v59 = vsel %vm894_vm8, 0, %v537_v6 }
  0xd8   :  { %vm578_vm13 = vcmp.lt.s32.totalorder %v577_v50, 0  ;;  %v943_v0 = vmul.u32.u64.low %v873_v55, %v289_v57  ;;  %v944_v2 = vmul.u32.u64.high %v873_v55, %v289_v57, %v943_v0  ;;  %v194_v3 = vadd.s32 %v848_v18, %v845_v21 }
  0xd9   :  { %v209_v39 = vsel %vm578_vm13, 0, %v577_v50  ;;  %v297_v12 = vmul.u32 %v873_v55, %v281_v23  ;;  %v300_v1 = vadd.s32 1, %v937_v61  ;;  %vm445_vm14 = vcmp.eq.s32.totalorder %v903_v38, 2 }
  0xda   :  { %v624_v52 = vpop.eup %623  ;;  %v210_v7 = vsub.s32 32, %v209_v39  ;;  %v214_v11 = vsub.s32 4294967266, %v209_v39  ;;  %v211_v14 = vshll.u32 %v202_v34, %v209_v39  ;;  %vm299_vm15 = vc.u32 %v944_v2, %v936_v22 }
  0xdb   :  { %v626_v49 = vpop.eup %625  ;;  %v446_v13 = vxor.u32 2147483648, %v624_v52  ;;  %v543_v4 = vadd.s32 3, %v539_v59  ;;  %v301_v24 = vsel %vm299_vm15, %v300_v1, %v937_v61  ;;  %vm442_vm0 = vcmp.eq.s32.totalorder %v903_v38, 0 }
  0xdc   :  { %v212_v15 = vshrl.u32 %v194_v3, %v210_v7  ;;  %v215_v16 = vadd.s32 127, %v214_v11  ;;  %v443_v21 = vxor.u32 2147483648, %v626_v49  ;;  %v302_v31 = vadd.s32 %v301_v24, %v297_v12 }
  0xdd   :  { %v447_v18 = vsel %vm445_vm14, %v446_v13, %v626_v49  ;;  %vm441_vm1 = vcmp.lt.s32.totalorder %v903_v38, 2  ;;  %vm438_vm2 = vweird.f32 %v697_v53  ;;  %v544_v27 = vand.u32 3, %v543_v4 }
  0xde   :  { %v213_v29 = vor.u32 %v212_v15, %v211_v14  ;;  %v216_v30 = vshll.u32 %v215_v16, 23  ;;  %v444_v55 = vsel %vm442_vm0, %v624_v52, %v443_v21  ;;  %v303_v34 = vadd.s32 536870912, %v302_v31 }
  0xdf   :  { %v448_v36 = vsel %vm441_vm1, %v444_v55, %v447_v18  ;;  %vm542_vm3 = vweird.f32 %v699_v54  ;;  %vm140_vm4 = vcmp.lt.s32.totalorder %v701_v56, 0  ;;  %vm549_vm5 = vcmp.eq.s32.totalorder %v544_v27, 2 }
  0xe0   :  { %v217_v32 = vor.u32 4788187, %v216_v30  ;;  %v449_v37 = vsel %vm438_vm2, nan, %v448_v36  ;;  %v220_v26 = vcvt.s32.f32 %v213_v29  ;;  %v959_v20 = vshrl.u32 %v303_v34, 30 }
  0xe1   :  { %557 = vst [vmem:[#allocation2 + $0x10] sm:$0xff] %v449_v37  ;;  %vm546_vm6 = vcmp.eq.s32.totalorder %v544_v27, 0  ;;  %v224_v42 = vsub.s32 4, %v880_v5  ;;  %vm545_vm7 = vcmp.lt.s32.totalorder %v544_v27, 2  ;;  %vm555_vm8 = vcmask 523264  }
  0xe2   :  { %v218_v60 = vand.u32 2147483647, %v217_v32  ;;  %v628_v28 = vpop.eup %627  ;;  %v305_v41 = vshll.u32 %v959_v20, 30  ;;  %vm139_vm9 = vcmp.le.f32.partialorder %v138_v10, 0.7853982  ;;  %v298_v51 = vadd.s32 %v936_v22, %v944_v2 }
  0xe3   :  { %v630_v40 = vpop.eup %629  ;;  %v550_v63 = vxor.u32 2147483648, %v628_v28  ;;  %v225_v46 = vsel %vm140_vm4, %v224_v42, %v880_v5  ;;  %vm230_vm14 = vweird.f32 %v701_v56  ;;  %vm244_vm15 = vcmp.lt.s32.totalorder %v713_v19, 0 }
  0xe4   :  { %v221_v33 = vmul.f32 %v220_v26, %v218_v60  ;;  %v547_v38 = vxor.u32 2147483648, %v630_v40  ;;  %v306_v58 = vsub.s32 %v302_v31, %v305_v41  ;;  %v227_v47 = vsel %vm139_vm9, 0, %v225_v46 }
  0xe5   :  { %v551_v35 = vsel %vm549_vm5, %v550_v63, %v630_v40  ;;  %v231_v6 = vadd.s32 3, %v227_v47  ;;  %v328_v4 = vsub.s32 4, %v959_v20  ;;  %vm243_vm0 = vcmp.le.f32.partialorder %v242_v62, 0.7853982 }
  0xe6   :  { %v222_v53 = vxor.u32 2147483648, %v221_v33  ;;  %v548_v25 = vsel %vm546_vm6, %v628_v28, %v547_v38  ;;  %v308_v43 = vsub.s32 0, %v306_v58 }
  0xe7   :  { %v552_v44 = vsel %vm545_vm7, %v548_v25, %v551_v35  ;;  %v232_v39 = vand.u32 3, %v231_v6  ;;  %v329_v18 = vsel %vm244_vm15, %v328_v4, %v959_v20 }
  0xe8   :  { %v223_v17 = vsel %vm140_vm4, %v222_v53, %v221_v33  ;;  %v553_v9 = vsel %vm542_vm3, nan, %v552_v44  ;;  %v580_v45 = vmin.u32 %v308_v43, %v306_v58  ;;  %v331_v29 = vsel %vm243_vm0, 0, %v329_v18 }
  0xe9   :  { %v226_v8 = vsel %vm139_vm9, %v701_v56, %v223_v17  ;;  %558 = vst.msk [vmem:[#allocation2 + $0x18] sm:$0xff] %vm555_vm8, %v553_v9  ;;  %vm237_vm11 = vcmp.eq.s32.totalorder %v232_v39, 2  ;;  %vm234_vm12 = vcmp.eq.s32.totalorder %v232_v39, 0  ;;  %vm233_vm13 = vcmp.lt.s32.totalorder %v232_v39, 2 }
  0xea   :  { %631 = vcosq.f32 %v226_v8  ;;  %v310_v10 = vclz %v580_v45  ;;  %v335_v56 = vadd.s32 3, %v331_v29  ;;  %vm334_vm4 = vweird.f32 %v713_v19 }
  0xeb   :  { %633 = vsinq.f32 %v226_v8 }
  0xec   :  { %v581_v48 = vadd.s32 4294967294, %v310_v10  ;;  %v336_v30 = vand.u32 3, %v335_v56 }
  0xee   :  { %vm582_vm10 = vcmp.lt.s32.totalorder %v581_v48, 0  ;;  %vm341_vm1 = vcmp.eq.s32.totalorder %v336_v30, 2  ;;  %vm338_vm2 = vcmp.eq.s32.totalorder %v336_v30, 0  ;;  %vm337_vm3 = vcmp.lt.s32.totalorder %v336_v30, 2 }
  0xef   :  { %v313_v50 = vsel %vm582_vm10, 0, %v581_v48 }
  0xf0   :  { %v314_v54 = vsub.s32 32, %v313_v50  ;;  %v318_v57 = vsub.s32 4294967266, %v313_v50  ;;  %v315_v61 = vshll.u32 %v306_v58, %v313_v50 }
  0xf2   :  { %v316_v23 = vshrl.u32 %v298_v51, %v314_v54  ;;  %v319_v0 = vadd.s32 127, %v318_v57 }
  0xf4   :  { %v317_v52 = vor.u32 %v316_v23, %v315_v61  ;;  %v320_v59 = vshll.u32 %v319_v0, 23 }
  0xf6   :  { %v321_v7 = vor.u32 4788187, %v320_v59  ;;  %v324_v1 = vcvt.s32.f32 %v317_v52 }
  0xf7   :  { %v632_v3 = vpop.eup %631 }
  0xf8   :  { %v634_v5 = vpop.eup %633  ;;  %v238_v11 = vxor.u32 2147483648, %v632_v3  ;;  %v322_v12 = vand.u32 2147483647, %v321_v7 }
  0xf9   :  { %v235_v49 = vxor.u32 2147483648, %v634_v5 }
  0xfa   :  { %v239_v13 = vsel %vm237_vm11, %v238_v11, %v634_v5  ;;  %v325_v2 = vmul.f32 %v324_v1, %v322_v12 }
  0xfb   :  { %v236_v22 = vsel %vm234_vm12, %v632_v3, %v235_v49 }
  0xfc   :  { %v240_v14 = vsel %vm233_vm13, %v236_v22, %v239_v13  ;;  %v326_v16 = vxor.u32 2147483648, %v325_v2 }
  0xfd   :  { %v241_v15 = vsel %vm230_vm14, nan, %v240_v14 }
  0xfe   :  { %554 = vst [vmem:[#allocation2] sm:$0xff] %v241_v15  ;;  %v327_v24 = vsel %vm244_vm15, %v326_v16, %v325_v2 }
  0xff   :  { %v330_v21 = vsel %vm243_vm0, %v713_v19, %v327_v24 }
 0x100   :  { %635 = vcosq.f32 %v330_v21 }
 0x101   :  { %637 = vsinq.f32 %v330_v21 }
 0x10d   :  { %v636_v31 = vpop.eup %635 }
 0x10e   :  { %v638_v55 = vpop.eup %637  ;;  %v342_v32 = vxor.u32 2147483648, %v636_v31 }
 0x10f   :  { %v339_v34 = vxor.u32 2147483648, %v638_v55 }
 0x110   :  { %v343_v36 = vsel %vm341_vm1, %v342_v32, %v638_v55 }
 0x111   :  { %v340_v62 = vsel %vm338_vm2, %v636_v31, %v339_v34 }
 0x112   :  { %v344_v27 = vsel %vm337_vm3, %v340_v62, %v343_v36 }
 0x113   :  { %v345_v37 = vsel %vm334_vm4, nan, %v344_v27 }
 0x114   :  { %556 = vst.msk [vmem:[#allocation2 + $0x8] sm:$0xff] %vm555_vm8, %v345_v37 }
 0x115   :  { %650 = shalt.err (!%p647_p4)
}
 0x116   :  { %s671_s16 = smov 256   ;;  %s672_s17 = smov 16  }
 0x117   :  { %570 = dma.vmem_to_hbm [thread:$0]  %s565_s1, 512, %s992_s2, [#allocation3], %s671_s16, %s671_s16, %s672_s17  }
 0x118   :  { %659 = dma.done.wait [#allocation3], 512  }
 0x119   :  { %660 = vsyncadd [#allocation3], 4294966784 }
 0x11a   :  { %574 = vsyncpa [#allocation3], 1 }

</bundles_post_ra>
